<compile_context>
chip_gen: v7x
topology: tpu7x:2x2x1
jax: 0.10.0
libtpu: 0.0.40
codegen_flags: <defaults>
</compile_context>

<pallas_src>
import jax
import jax.numpy as jnp
from jax.experimental import pallas as pl
from jax.experimental.pallas import tpu as pltpu

MAX_NORM = 1.0
EPS = 1e-7  # matches torch.renorm eps used by nn.Embedding(max_norm=...)


def skipgram_matmul_kernel(x_ref, w_ref, b_ref, out_ref):
    """One grid step computes one (row tile, vocab tile) block of the logits.

    x_ref  : (tile_n, E)       bf16  VMEM  (renormed embeddings row tile)
    w_ref  : (E, tile_v)       bf16  VMEM  (pre-transposed linear weight tile)
    b_ref  : (1, tile_v)       f32   VMEM  (bias vocab tile)
    out_ref: (tile_n, tile_v)  f32   VMEM
    """
    acc = jnp.dot(x_ref[...], w_ref[...], preferred_element_type=jnp.float32)
    out_ref[...] = (acc + b_ref[...]).astype(out_ref.dtype)


def _round_up(x, m):
    return -(-x // m) * m


def skipgram_forward(idx, emb_table, w, b, *, out_dtype=jnp.float32):
    """idx: (B, T) int32; emb_table: (V, E); w: (V, E) [PyTorch layout]; b: (V,)."""
    B, T = idx.shape
    V, E = emb_table.shape
    N = B * T
    assert w.shape == (V, E) and b.shape == (V,)
    assert V % 128 == 0, "vocab size must be a multiple of 128"

    # ---- gather + max_norm renorm (nn.Embedding(max_norm=...) forward semantics) ----
    # Gather first, cast second: avoids materializing a full (V, E) f32 table copy.
    x = jnp.take(emb_table, idx.reshape(N), axis=0).astype(jnp.float32)  # (N, E)
    norm = jnp.sqrt(jnp.sum(x * x, axis=-1, keepdims=True))
    scale = jnp.where(norm > MAX_NORM, MAX_NORM / (norm + EPS), 1.0)
    x = x * scale
    # TODO(synk): torch also renormalizes the embedding weight rows in place during
    # forward; only the forward output is reproduced here.

    # ---- row tiling: multiple of 16 (bf16 sublane packing on the MXU LHS) ----
    tile_n = _round_up(N, 16) if N <= 512 else 512
    n_pad = _round_up(N, tile_n)

    # ---- vocab tiling: largest multiple of 128 dividing V that fits the VMEM budget ----
    out_bytes = jnp.dtype(out_dtype).itemsize

    def tile_footprint(tv):
        return (2 * tile_n * E * 2          # x tile, double-buffered bf16
                + 2 * E * tv * 2            # W tile, double-buffered bf16
                + 2 * tile_n * tv * out_bytes  # out tile, double-buffered
                + 2 * tv * 4)               # bias tile, double-buffered f32

    BUDGET = 24 * 1024 * 1024  # conservative across v5e / v6e / v7x
    candidates = [tv for tv in range(128, V + 1, 128)
                  if V % tv == 0 and tile_footprint(tv) <= BUDGET]
    assert candidates, "no vocab tile fits the VMEM budget"
    tile_v = max(candidates)
    # Keep >= 2 total grid steps so both v7x TensorCores get work (no cost on v5e/v6e).
    if (n_pad // tile_n) * (V // tile_v) < 2:
        smaller = [tv for tv in candidates if tv < tile_v]
        if smaller:
            tile_v = max(smaller)

    # ---- operand prep: stream x/W in bf16; W pre-transposed ONCE to (E, V) ----
    x_bf16 = x.astype(jnp.bfloat16)
    if n_pad != N:
        x_bf16 = jnp.pad(x_bf16, ((0, n_pad - N), (0, 0)))
    w_t = w.astype(jnp.bfloat16).T           # (E, V): standard MXU RHS, no per-step transpose
    b2 = b.reshape(1, V).astype(jnp.float32)

    grid = (n_pad // tile_n, V // tile_v)

    vmem_limit = int(min(max(2 * tile_footprint(tile_v), 16 * 1024 * 1024),
                         48 * 1024 * 1024))

    cost = pl.CostEstimate(
        flops=2 * n_pad * E * V,
        transcendentals=0,
        bytes_accessed=V * E * 2 + n_pad * E * 2 + V * 4 + n_pad * V * out_bytes,
    )

    out = pl.pallas_call(
        skipgram_matmul_kernel,
        out_shape=jax.ShapeDtypeStruct((n_pad, V), out_dtype),
        grid_spec=pltpu.PrefetchScalarGridSpec(
            num_scalar_prefetch=0,
            grid=grid,
            in_specs=[
                pl.BlockSpec((tile_n, E), lambda i, j: (i, 0)),     # x row tile
                pl.BlockSpec((E, tile_v), lambda i, j: (0, j)),     # W vocab tile (pre-T)
                pl.BlockSpec((1, tile_v), lambda i, j: (0, j)),     # bias vocab tile
            ],
            out_specs=pl.BlockSpec((tile_n, tile_v), lambda i, j: (i, j)),
        ),
        compiler_params=pltpu.CompilerParams(
            dimension_semantics=("parallel", "parallel"),  # independent tiles (megacore)
            vmem_limit_bytes=vmem_limit,
        ),
        cost_estimate=cost,
    )(x_bf16, w_t, b2)

    return out[:N].reshape(B, T, V)


def skipgram_reference(idx, emb_table, w, b):
    x = jnp.take(emb_table, idx, axis=0).astype(jnp.float32)        # (B, T, E)
    norm = jnp.sqrt(jnp.sum(x * x, axis=-1, keepdims=True))
    scale = jnp.where(norm > MAX_NORM, MAX_NORM / (norm + EPS), 1.0)
    x = x * scale
    return x @ w.T + b


if __name__ == "__main__":
    # Small, module-consistent shapes.
    vocab_size = 2048
    embed_size = 128
    batch, seq = 2, 8

    key = jax.random.PRNGKey(0)
    k_idx, k_emb, k_w, k_b = jax.random.split(key, 4)

    # Deterministic parameter init (synthetic; mimics PyTorch init styles).
    emb_table = jax.random.normal(k_emb, (vocab_size, embed_size), jnp.float32)
    bound = 1.0 / (embed_size ** 0.5)
    w = jax.random.uniform(k_w, (vocab_size, embed_size), jnp.float32, -bound, bound)
    b = jax.random.uniform(k_b, (vocab_size,), jnp.float32, -bound, bound)

    idx = jax.random.randint(k_idx, (batch, seq), 0, vocab_size, jnp.int32)

    out = skipgram_forward(idx, emb_table, w, b)
    out = jax.block_until_ready(out)

    ref = skipgram_reference(idx, emb_table, w, b)
    assert out.shape == (batch, seq, vocab_size)
    # bf16-streamed GEMM with f32 accumulation vs pure-f32 reference.
    assert jnp.allclose(out, ref, atol=1e-2, rtol=1e-2), "mismatch vs JAX reference"

    print("KERNEL_OK")
</pallas_src>

<mosaic_0001>
module attributes {stable_mosaic.version = 11 : i64} {
  func.func @skipgram_matmul_kernel(%arg0: i32, %arg1: i32, %arg2: memref<16x128xbf16, #tpu.memory_space<vmem>>, %arg3: memref<128x1024xbf16, #tpu.memory_space<vmem>>, %arg4: memref<1x1024xf32, #tpu.memory_space<vmem>>, %arg5: memref<16x1024xf32, #tpu.memory_space<vmem>>) attributes {dimension_semantics = [#tpu.dimension_semantics<parallel>, #tpu.dimension_semantics<parallel>], iteration_bounds = array<i64: 1, 2>, scalar_prefetch = 0 : i64, scratch_operands = 0 : i64, tpu.core_type = #tpu.core_type<tc>, window_params = [{transform_indices = @transform_0, window_bounds = array<i64: 16, 128>}, {transform_indices = @transform_1, window_bounds = array<i64: 128, 1024>}, {transform_indices = @transform_2, window_bounds = array<i64: 1, 1024>}, {transform_indices = @transform_3, window_bounds = array<i64: 16, 1024>}]} {
    %c0 = arith.constant 0 : index
    %c0_0 = arith.constant 0 : index
    %0 = vector.load %arg2[%c0, %c0_0] : memref<16x128xbf16, #tpu.memory_space<vmem>>, vector<16x128xbf16>
    %c0_1 = arith.constant 0 : index
    %c0_2 = arith.constant 0 : index
    %1 = vector.load %arg3[%c0_1, %c0_2] : memref<128x1024xbf16, #tpu.memory_space<vmem>>, vector<128x1024xbf16>
    %cst = arith.constant dense<0.000000e+00> : vector<16x1024xf32>
    %2 = tpu.matmul %0, %1, %cst {dimension_numbers = #tpu.dot_dimension_numbers<[1], [0], [0], [1], [0, 0, 1, 1], [], []>} : vector<16x128xbf16>, vector<128x1024xbf16>, vector<16x1024xf32> -> vector<16x1024xf32>
    %c0_3 = arith.constant 0 : index
    %c0_4 = arith.constant 0 : index
    %3 = vector.load %arg4[%c0_3, %c0_4] : memref<1x1024xf32, #tpu.memory_space<vmem>>, vector<1x1024xf32>
    %4 = vector.broadcast %3 : vector<1x1024xf32> to vector<16x1024xf32>
    %5 = arith.addf %2, %4 : vector<16x1024xf32>
    %c0_5 = arith.constant 0 : index
    %c0_6 = arith.constant 0 : index
    %6 = vector.load %arg5[%c0_5, %c0_6] : memref<16x1024xf32, #tpu.memory_space<vmem>>, vector<16x1024xf32>
    tpu.vector_store %arg5[%c0_5, %c0_6], %5 {strides = array<i32>} : memref<16x1024xf32, #tpu.memory_space<vmem>>, vector<16x1024xf32>,
    return
  }
  func.func @transform_0(%arg0: i32, %arg1: i32) -> (i32, i32) {
    %c0_i32 = arith.constant 0 : i32
    %c0_i32_0 = arith.constant 0 : i32
    return %arg0, %c0_i32 : i32, i32
  }
  func.func @transform_1(%arg0: i32, %arg1: i32) -> (i32, i32) {
    %c0_i32 = arith.constant 0 : i32
    %c0_i32_0 = arith.constant 0 : i32
    return %c0_i32, %arg1 : i32, i32
  }
  func.func @transform_2(%arg0: i32, %arg1: i32) -> (i32, i32) {
    %c0_i32 = arith.constant 0 : i32
    %c0_i32_0 = arith.constant 0 : i32
    return %c0_i32, %arg1 : i32, i32
  }
  func.func @transform_3(%arg0: i32, %arg1: i32) -> (i32, i32) {
    %c0_i32 = arith.constant 0 : i32
    return %arg0, %arg1 : i32, i32
  }
}

</mosaic_0001>

<bundles_post_ra>
// kernel: tpu_custom_call.1
= control target key start
LH: loop header
LB: loop body
LE: loop exit
PB: predicated region body
PF: predicated region fallthrough
CT: control target
= control target key end

     0   :  { %s1764_s0 = inlined_call_operand.hbm [shape: bf16[16,128], index: 0, kind: input, shape index: {}]   ;;  %s1765_s1 = inlined_call_operand.hbm [shape: bf16[128,2048], index: 1, kind: input, shape index: {}]   ;;  %s1766_s2 = inlined_call_operand.hbm [shape: f32[1,2048], index: 2, kind: input, shape index: {}]   ;;  %s1767_s3 = inlined_call_operand.hbm [shape: f32[16,2048], index: 3, kind: output, shape index: {}]  }
   0x1   :  { %1776 = sst [smem:[#allocation13_spill]] %s1765_s1 }
   0x2   :  { %8 = vsyncpa [#allocation3], 0 }
   0x3   :  { %9 = vsyncpa [#allocation6], 0 }
   0x4   :  { %11 = vsyncpa [#allocation6 + $0x1], 0 }
   0x5   :  { %12 = vsyncpa [#allocation4], 0 }
   0x6   :  { %14 = vsyncpa [#allocation4 + $0x1], 0  ;;  %s1410_s12 = smov 0   ;;  %s1412_s13 = smov 0  }
   0x7   :  { %s1414_s14 = smov 0   ;;  %s1416_s15 = smov 0  }
   0x8   :  { %s1418_s16 = smov 0   ;;  %s1420_s17 = smov 0  }
   0x9 LB: > { %s29_s18 = sadd.s32 1, %s1371_s16  ;;  %s65_s19 = sadd.s32 1, %s1363_s14  ;;  %s1375_s17 = sphi %s1420_s17, %s20_s17   ;;  %s1371_s16 = sphi %s1418_s16, %s1800_s16   ;;  %s1367_s15 = sphi %s1416_s15, %s1799_s15   ;;  %s1363_s14 = sphi %s1414_s14, %s1798_s14   ;;  %s1359_s13 = sphi %s1412_s13, %s1797_s13   ;;  %s1355_s12 = sphi %s1410_s12, %s1796_s12  }
   0xa   : > { %p30_p0 = scmp.ge.s32.totalorder %s29_s18, 2  ;;  %p72_p1 = scmp.ne.s32.totalorder %s1363_s14, %s1359_s13 }
   0xb   : > { %p73_p2 = scmp.eq.s32.totalorder %s1375_s17, 0  ;;  %p1139_p5 = scmp.lt.s32.totalorder %s1375_s17, 2 }
   0xc   : > { %s1802_s18 = smov (%p30_p0, %s29_s18), 0  ;;  %s172_s21 = sand.u32 1, %s1375_s17  }
   0xd   : > { %1777 = sst [smem:[#allocation12_spill]] %s1802_s18  ;;  %p74_p4 = por %p73_p2, %p72_p1 }
   0xe   : > { %s62_s20 = ssub.s32 %s1371_s16, %s1802_s18  ;;  %s174_s22 = sand.u32 1, %s1363_s14  }
   0xf   : > { %p63_p6 = scmp.eq.s32.totalorder %s62_s20, 0  ;;  %s1110_s23 = sshll.u32 %s1371_s16, 9 }
  0x10   : > { %s1029_s25 = sshll.u32 %s174_s22, 9  ;;  %s1778_s1 = sld [smem:[#allocation13_spill]] }
  0x11   : > { %s1458_s24 = scalar_select %p63_p6, %s1363_s14, %s65_s19  }
  0x12   : > { %p1467_p7 = pnand %p1139_p5, %p74_p4  ;;  %s176_s30 = scalar_lea.vmem [#allocation5], %s1029_s25 }
  0x13   : > { %s183_s4 = sshll.u32 %s176_s30, 4  ;;  %s1473_s5 = scalar_lea.sflag [#allocation6], %s172_s21  ;;  %s1471_s4 = int_to_ptr.vmem [resolvable:$true] %s183_s4 }
  0x14   : > { %s1779_s29 = scalar_select %p1467_p7, 1, 0 }
  0x15   : > { %p1770_p9 = pneg %p1467_p7 }
  0x16   : > { %s1465_s28 = scalar_lea.hbm %s1778_s1, %s1110_s23  ;;  %s1206_s9 = scalar_lea.hbm %s1778_s1, 16384 }
  0x17   : > { %s1201_s6 = scalar_lea.hbm %s1465_s28, 8192  ;;  %p1207_p12 = scmp.lt.u32.totalorder %s1465_s28, %s1778_s1 }
  0x18   : > { %p1202_p8 = scmp.ne.s32.totalorder %s1465_s28, %s1201_s6  ;;  %p1208_p13 = scmp.lt.u32.totalorder %s1206_s9, %s1201_s6 }
  0x19   : > { %p1210_p2 = scmp.lt.u32.totalorder %s1201_s6, %s1465_s28 }
  0x1a   : > { %p1204_p10 = pnand %p1770_p9, %p1202_p8  ;;  %p1209_p0 = por %p1208_p13, %p1207_p12 }
  0x1c   : > { %p1205_p11 = pneg %p1204_p10  ;;  %p1211_p4 = por %p1210_p2, %p1209_p0 }
  0x1e   : > { %p1212_p5 = pnand %p1211_p4, %p1205_p11 }
  0x20   : > { %1215 = shalt.err (!%p1212_p5)
}
  0x21   : > { %s1216_s19 = scalar_lea.vmem %s1471_s4, 8192  ;;  %s1377_s20 = smov [#allocation5]  }
  0x22   : > { %p1217_p6 = scmp.ne.s32.totalorder %s1471_s4, %s1216_s19  ;;  %s1221_s21 = sshll.u32 %s1377_s20, 4  ;;  %s1222_s21 = int_to_ptr.vmem [resolvable:$false] %s1221_s21 }
  0x23   : > { %s1223_s23 = scalar_lea.vmem %s1222_s21, 16384  ;;  %p1224_p3 = scmp.lt.s32.totalorder %s1471_s4, %s1222_s21 }
  0x24   : > { %p1219_p8 = pnand %p1217_p6, %p1770_p9  ;;  %p1225_p12 = scmp.lt.s32.totalorder %s1223_s23, %s1216_s19 }
  0x26   : > { %p1220_p10 = pneg %p1219_p8  ;;  %p1226_p13 = por %p1225_p12, %p1224_p3 }
  0x28   : > { %p1227_p0 = pnand %p1226_p13, %p1220_p10 }
  0x2a   : > { %1230 = shalt.err (!%p1227_p0)
}
  0x2b   : > { %s1378_s25 = smov 1024   ;;  %s1379_s26 = smov 512  }
  0x2c   : > { %s1380_s27 = smov 32   ;;  %s1502_s30 = sadd.s32 4294967295, %s1375_s17  }
  0x2d   : > { %1130 = dma.hbm_to_vmem [thread:$0]  (!%p1467_p7), %s1465_s28, 8192, %s1471_s4, %s1473_s5, %s1378_s25, %s1379_s26, %s1380_s27  }
  0x2e   : > { %s1025_s6 = sadd.s32 4294967294, %s1375_s17   ;;  %p78_p3 = scmp.ne.s32.totalorder %s1359_s13, %s1355_s12 }
  0x2f   : > { %p1769_p11 = scmp.eq.s32.totalorder %s1502_s30, 0  ;;  %p130_p2 = scmp.eq.s32.totalorder %s1502_s30, 1 }
  0x30   : > { %p136_p4 = scmp.eq.s32.totalorder %s1025_s6, 1  ;;  %p1026_p6 = scmp.ge.s32.totalorder %s1375_s17, 1 }
  0x31   : > { %p1511_p5 = por %p1769_p11, %p78_p3  ;;  %p1519_p8 = por %p130_p2, %p72_p1 }
  0x32   : > { %p1523_p10 = por %p136_p4, %p78_p3  ;;  %p143_p12 = scmp.lt.s32.totalorder %s1375_s17, 3 }
  0x33   : > { %s1780_s7 = scalar_select %p1511_p5, 1, 0 }
  0x34   : > { %s1781_s28 = scalar_select %p1519_p8, 1, 0 }
  0x35   : > { %s1782_s4 = scalar_select %p1523_p10, 1, 0 }
  0x36   : > { %p1528_p13 = pnand %p1026_p6, %p143_p12  ;;  %s1381_s9 = smov [#allocation2]  }
  0x37   : > { %s158_s10 = sshll.u32 %s1381_s9, 4  ;;  %s1032_s11 = sshll.u32 %s174_s22, 3  ;;  %s1532_s10 = int_to_ptr.vmem [resolvable:$true] %s158_s10 }
  0x38   : > { %s1783_s8 = scalar_select %p1528_p13, 1, 0 }
  0x39   : > { %p1123_p0 = pneg %p1528_p13  ;;  %s1111_s19 = sshll.u32 %s1371_s16, 7 }
  0x3a   : > { %s1548_s25 = scalar_lea.hbm %s1766_s2, %s1111_s19  ;;  %s197_s26 = scalar_lea.vmem [#allocation7], %s1032_s11 }
  0x3b   : > { %p1541_p1 = pnand %p1123_p0, %p1769_p11  ;;  %s205_s27 = sshll.u32 %s197_s26, 4  ;;  %s1550_s27 = int_to_ptr.vmem [resolvable:$true] %s205_s27 }
  0x3c   : > { %s1231_s22 = scalar_lea.hbm %s1764_s0, 128 }
  0x3d   : > { %p1232_p3 = scmp.ne.s32.totalorder %s1764_s0, %s1231_s22  ;;  %p1233_p2 = pneg %p1541_p1 }
  0x3e   : > { %p1238_p12 = scmp.lt.u32.totalorder %s1231_s22, %s1764_s0 }
  0x3f   : > { %p1234_p4 = pnand %p1233_p2, %p1232_p3 }
  0x41   : > { %p1235_p6 = pneg %p1234_p4 }
  0x43   : > { %p1240_p0 = pnand %p1238_p12, %p1235_p6 }
  0x45   : > { %1243 = shalt.err (!%p1240_p0)
}
  0x46   : > { %s1244_s11 = scalar_lea.vmem %s1532_s10, 128  ;;  %p1252_p8 = scmp.lt.s32.totalorder %s1532_s10, %s1532_s10 }
  0x47   : > { %p1245_p11 = scmp.ne.s32.totalorder %s1532_s10, %s1244_s11  ;;  %p1253_p5 = scmp.lt.s32.totalorder %s1244_s11, %s1244_s11 }
  0x49   : > { %p1247_p9 = pnand %p1245_p11, %p1233_p2  ;;  %p1254_p13 = por %p1253_p5, %p1252_p8 }
  0x4b   : > { %p1248_p10 = pneg %p1247_p9 }
  0x4d   : > { %p1255_p7 = pnand %p1254_p13, %p1248_p10 }
  0x4f   : > { %1258 = shalt.err (!%p1255_p7)
}
  0x50   : > { %s1382_s1 = smov 64   ;;  %s1383_s18 = smov 4  }
  0x51   : > { %1126 = dma.hbm_to_vmem [thread:$0]  (!%p1541_p1), %s1764_s0, 128, %s1532_s10, [#allocation3], %s1382_s1, %s1382_s1, %s1383_s18  }
  0x52   : > { %s1259_s6 = scalar_lea.hbm %s1548_s25, 128  ;;  %p1785_p11 = scmp.ne.s32.totalorder %s1779_s29, 0 }
  0x53   : > { %p1260_p9 = scmp.ne.s32.totalorder %s1548_s25, %s1259_s6  ;;  %s1264_s21 = scalar_lea.hbm %s1766_s2, 256 }
  0x54   : > { %p1786_p5 = pneg %p1785_p11  ;;  %p1265_p10 = scmp.lt.u32.totalorder %s1548_s25, %s1766_s2 }
  0x55   : > { %p1266_p13 = scmp.lt.u32.totalorder %s1264_s21, %s1259_s6  ;;  %p1268_p2 = scmp.lt.u32.totalorder %s1259_s6, %s1548_s25 }
  0x56   : > { %p1262_p8 = pnand %p1260_p9, %p1786_p5 }
  0x57   : > { %p1267_p3 = por %p1266_p13, %p1265_p10 }
  0x58   : > { %p1263_p7 = pneg %p1262_p8 }
  0x59   : > { %p1269_p4 = por %p1268_p2, %p1267_p3 }
  0x5b   : > { %p1270_p6 = pnand %p1269_p4, %p1263_p7 }
  0x5d   : > { %1273 = shalt.err (!%p1270_p6)
}
  0x5e   : > { %s1274_s10 = scalar_lea.vmem %s1550_s27, 128  ;;  %p1787_p12 = pmov %p1786_p5 }
  0x5f   : > { %p1275_p1 = scmp.ne.s32.totalorder %s1550_s27, %s1274_s10  ;;  %s1384_s20 = smov [#allocation7]  }
  0x60   : > { %s1279_s1 = sshll.u32 %s1384_s20, 4  ;;  %s1280_s1 = int_to_ptr.vmem [resolvable:$false] %s1279_s1 }
  0x61   : > { %p1277_p0 = pnand %p1275_p1, %p1787_p12  ;;  %s1281_s18 = scalar_lea.vmem %s1280_s1, 256 }
  0x62   : > { %p1282_p5 = scmp.lt.s32.totalorder %s1550_s27, %s1280_s1  ;;  %p1283_p8 = scmp.lt.s32.totalorder %s1281_s18, %s1274_s10 }
  0x63   : > { %p1278_p9 = pneg %p1277_p0 }
  0x64   : > { %p1284_p10 = por %p1283_p8, %p1282_p5 }
  0x66   : > { %p1285_p13 = pnand %p1284_p10, %p1278_p9 }
  0x68   : > { %1288 = shalt.err (!%p1285_p13)
}
  0x69   : > { %1133 = dma.hbm_to_vmem [thread:$0]  (!%p1785_p11), %s1548_s25, 128, %s1550_s27, %s1473_s5  }
  0x6a   : > { %p1788_p7 = scmp.ne.s32.totalorder %s1783_s8, 0 }
  0x6b   : > { %p1789_p3 = scmp.eq.s32.totalorder (!%p1788_p7), %s1502_s30, 0 }
  0x6c   : > { %214 = sbr.rel (%p1788_p7) target bundleno = 422 (0x1a6), region = 32 }
  0x73   : > { %1342 = dma.done.wait (%p1789_p3), [#allocation3], 128   ;;  %p1790_p2 = pmov %p1789_p3 }
  0x74   : > { %s220_s19 = sand.u32 1, %s1502_s30   ;;  %s1605_s26 = sand.u32 1, %s1359_s13  }
  0x75   : > { %1344 = vsyncadd (%p1790_p2), [#allocation3], 4294967168  ;;  %s1037_s29 = sshll.u32 %s1605_s26, 9  ;;  %s221_s6 = scalar_lea.sflag [#allocation6], %s220_s19 }
  0x76   : > { %s1608_s9 = scalar_lea.vmem [#allocation5], %s1037_s29  ;;  %p1791_p11 = scmp.ne.s32.totalorder %s1780_s7, 0 }
  0x78   : > { %1346 = dma.done.wait (%p1791_p11), %s221_s6, 8320  }
  0x79   : > { %1348 = vsyncadd (%p1791_p11), %s221_s6, 4294958976  ;;  %v1385_v0 = vmov 0   ;;  %v269_v1 = vld [vmem:[%s1608_s9] sm:$0xff]  ;;  %v270_v3 = vld [vmem:[%s1608_s9 + $0x8] sm:$0xff]  ;;  %s1038_s5 = sshll.u32 %s1605_s26, 3  ;;  %s1039_s7 = sshll.u32 %s1605_s26, 7 }
  0x7a   : > { %733 = vmatprep.mubr.bf16.mxu0 %v1385_v0  ;;  %776 = vmatprep.mubr.bf16.mxu1 %v1385_v0  ;;  %v273_v2 = vld [vmem:[%s1608_s9 + $0x20] sm:$0xff]  ;;  %v274_v5 = vld [vmem:[%s1608_s9 + $0x28] sm:$0xff]  ;;  %v271_v63 = vld [vmem:[%s1608_s9 + $0x10] sm:$0xff]  ;;  %s233_s30 = scalar_lea.vmem [#allocation7], %s1038_s5  ;;  %s1690_s8 = scalar_lea.vmem [#allocation8], %s1039_s7 }
  0x7b   : > { %v1042_v4 = vcombine.high %v269_v1, %v273_v2  ;;  %v1041_v6 = vcombine.low %v269_v1, %v273_v2  ;;  %v277_v7 = vld [vmem:[%s1608_s9 + $0x40] sm:$0xff]  ;;  %v1044_v9 = vcombine.high %v270_v3, %v274_v5  ;;  %v1043_v10 = vcombine.low %v270_v3, %v274_v5  ;;  %v278_v12 = vld [vmem:[%s1608_s9 + $0x48] sm:$0xff]  ;;  %v275_v1 = vld [vmem:[%s1608_s9 + $0x30] sm:$0xff]  ;;  %s1112_s25 = sshll.u32 %s1367_s15, 10  ;;  %s906_s27 = sshll.u32 %s1690_s8, 4  ;;  %s1710_s27 = int_to_ptr.vmem [resolvable:$true] %s906_s27 }
  0x7c   : > { %v281_v8 = vld [vmem:[%s1608_s9 + $0x60] sm:$0xff]  ;;  %v282_v13 = vld [vmem:[%s1608_s9 + $0x68] sm:$0xff]  ;;  %v272_v2 = vld [vmem:[%s1608_s9 + $0x18] sm:$0xff]  ;;  %s1706_s21 = scalar_lea.hbm %s1767_s3, %s1112_s25  ;;  %s890_s23 = scalar_lea.sflag [#allocation4], %s1605_s26 }
  0x7d   : > { %v1050_v11 = vcombine.high %v277_v7, %v281_v8  ;;  %v285_v14 = vld [vmem:[%s1608_s9 + $0x80] sm:$0xff]  ;;  %701 = vmatprep.subr.bf16.mxu0 %v1042_v4  ;;  %v1052_v15 = vcombine.high %v278_v12, %v282_v13  ;;  %v286_v17 = vld [vmem:[%s1608_s9 + $0x88] sm:$0xff]  ;;  %744 = vmatprep.subr.bf16.mxu1 %v1044_v9  ;;  %v1049_v19 = vcombine.low %v277_v7, %v281_v8  ;;  %v276_v3 = vld [vmem:[%s1608_s9 + $0x38] sm:$0xff]  ;;  %s1289_s11 = scalar_lea.vmem %s1710_s27, 2048  ;;  %p1792_p6 = scmp.ne.s32.totalorder %s1781_s28, 0 }
  0x7e   : > { %v289_v16 = vld [vmem:[%s1608_s9 + $0xa0] sm:$0xff]  ;;  %v290_v18 = vld [vmem:[%s1608_s9 + $0xa8] sm:$0xff]  ;;  %702 = vmatpush1.bf16.msra.mxu0 %v1041_v6  ;;  %745 = vmatpush1.bf16.msra.mxu1 %v1043_v10  ;;  %v1051_v20 = vcombine.low %v278_v12, %v282_v13  ;;  %v1046_v6 = vcombine.high %v271_v63, %v275_v1  ;;  %v1048_v7 = vcombine.high %v272_v2, %v276_v3  ;;  %v279_v8 = vld [vmem:[%s1608_s9 + $0x50] sm:$0xff]  ;;  %p1290_p4 = scmp.ne.s32.totalorder %s1710_s27, %s1289_s11  ;;  %s1386_s10 = smov [#allocation8]  }
  0x7f   : > { %703 = vmatprep.subr.bf16.mxu0 %v1050_v11  ;;  %v1058_v21 = vcombine.high %v285_v14, %v289_v16  ;;  %746 = vmatprep.subr.bf16.mxu1 %v1052_v15  ;;  %v1060_v22 = vcombine.high %v286_v17, %v290_v18  ;;  %v293_v23 = vld [vmem:[%s1608_s9 + $0xc0] sm:$0xff]  ;;  %v294_v25 = vld [vmem:[%s1608_s9 + $0xc8] sm:$0xff]  ;;  %v1057_v27 = vcombine.low %v285_v14, %v289_v16  ;;  %v283_v9 = vld [vmem:[%s1608_s9 + $0x70] sm:$0xff]  ;;  %s1293_s20 = sshll.u32 %s1386_s10, 4  ;;  %s1294_s20 = int_to_ptr.vmem [resolvable:$false] %s1293_s20 }
  0x80   : > { %v297_v24 = vld [vmem:[%s1608_s9 + $0xe0] sm:$0xff]  ;;  %v298_v26 = vld [vmem:[%s1608_s9 + $0xe8] sm:$0xff]  ;;  %v1059_v28 = vcombine.low %v286_v17, %v290_v18  ;;  %v1654_v10 = vld [vmem:[#allocation2] sm:$0xff]   ;;  %v1045_v13 = vcombine.low %v271_v63, %v275_v1  ;;  %v1047_v14 = vcombine.low %v272_v2, %v276_v3  ;;  %v1054_v15 = vcombine.high %v279_v8, %v283_v9  ;;  %p1291_p1 = pnand %p1290_p4, %p1792_p6  ;;  %s1295_s1 = scalar_lea.vmem %s1294_s20, 4096 }
  0x81   : > { %v1066_v29 = vcombine.high %v293_v23, %v297_v24  ;;  %v1068_v30 = vcombine.high %v294_v25, %v298_v26  ;;  %v301_v31 = vld [vmem:[%s1608_s9 + $0x100] sm:$0xff]  ;;  %v302_v33 = vld [vmem:[%s1608_s9 + $0x108] sm:$0xff]  ;;  %v1065_v35 = vcombine.low %v293_v23, %v297_v24  ;;  %v1067_v36 = vcombine.low %v294_v25, %v298_v26  ;;  %v280_v11 = vld [vmem:[%s1608_s9 + $0x58] sm:$0xff]  ;;  %p1296_p0 = scmp.lt.s32.totalorder %s1710_s27, %s1294_s20  ;;  %p1297_p9 = scmp.lt.s32.totalorder %s1295_s1, %s1289_s11 }
  0x82   : > { %704 = vmatpush1.bf16.msra.mxu0 %v1049_v19  ;;  %747 = vmatpush1.bf16.msra.mxu1 %v1051_v20  ;;  %v305_v32 = vld [vmem:[%s1608_s9 + $0x120] sm:$0xff]  ;;  %v306_v34 = vld [vmem:[%s1608_s9 + $0x128] sm:$0xff]  ;;  %v284_v12 = vld [vmem:[%s1608_s9 + $0x78] sm:$0xff]  ;;  %v335_v3 = vlaneseq  ;;  %p1292_p12 = pneg %p1291_p1 }
  0x83   : > { %705 = vmatprep.subr.bf16.mxu0 %v1058_v21  ;;  %748 = vmatprep.subr.bf16.mxu1 %v1060_v22  ;;  %v1074_v37 = vcombine.high %v301_v31, %v305_v32  ;;  %v1076_v38 = vcombine.high %v302_v33, %v306_v34  ;;  %v309_v39 = vld [vmem:[%s1608_s9 + $0x140] sm:$0xff]  ;;  %v310_v41 = vld [vmem:[%s1608_s9 + $0x148] sm:$0xff]  ;;  %v1073_v43 = vcombine.low %v301_v31, %v305_v32  ;;  %v287_v17 = vld [vmem:[%s1608_s9 + $0x90] sm:$0xff]  ;;  %p1298_p5 = por %p1297_p9, %p1296_p0 }
  0x84   : > { %v313_v40 = vld [vmem:[%s1608_s9 + $0x160] sm:$0xff]  ;;  %v314_v42 = vld [vmem:[%s1608_s9 + $0x168] sm:$0xff]  ;;  %v1075_v44 = vcombine.low %v302_v33, %v306_v34  ;;  %v1056_v16 = vcombine.high %v280_v11, %v284_v12  ;;  %v291_v18 = vld [vmem:[%s1608_s9 + $0xb0] sm:$0xff]  ;;  %v1053_v21 = vcombine.low %v279_v8, %v283_v9  ;;  %v1055_v22 = vcombine.low %v280_v11, %v284_v12 }
  0x85   : > { %v1082_v45 = vcombine.high %v309_v39, %v313_v40  ;;  %v1084_v46 = vcombine.high %v310_v41, %v314_v42  ;;  %v317_v47 = vld [vmem:[%s1608_s9 + $0x180] sm:$0xff]  ;;  %v318_v49 = vld [vmem:[%s1608_s9 + $0x188] sm:$0xff]  ;;  %v1081_v51 = vcombine.low %v309_v39, %v313_v40  ;;  %v1083_v52 = vcombine.low %v310_v41, %v314_v42  ;;  %v288_v19 = vld [vmem:[%s1608_s9 + $0x98] sm:$0xff]  ;;  %p1299_p8 = pnand %p1298_p5, %p1292_p12 }
  0x86   : > { %706 = vmatpush1.bf16.msra.mxu0 %v1057_v27  ;;  %749 = vmatpush1.bf16.msra.mxu1 %v1059_v28  ;;  %v321_v48 = vld [vmem:[%s1608_s9 + $0x1a0] sm:$0xff]  ;;  %v322_v50 = vld [vmem:[%s1608_s9 + $0x1a8] sm:$0xff]  ;;  %v292_v20 = vld [vmem:[%s1608_s9 + $0xb8] sm:$0xff]  ;;  %v1062_v23 = vcombine.high %v287_v17, %v291_v18 }
  0x87   : > { %707 = vmatprep.subr.bf16.mxu0 %v1066_v29  ;;  %750 = vmatprep.subr.bf16.mxu1 %v1068_v30  ;;  %v1090_v53 = vcombine.high %v317_v47, %v321_v48  ;;  %v1092_v54 = vcombine.high %v318_v49, %v322_v50  ;;  %v325_v55 = vld [vmem:[%s1608_s9 + $0x1c0] sm:$0xff]  ;;  %v326_v57 = vld [vmem:[%s1608_s9 + $0x1c8] sm:$0xff]  ;;  %v1089_v59 = vcombine.low %v317_v47, %v321_v48  ;;  %v295_v25 = vld [vmem:[%s1608_s9 + $0xd0] sm:$0xff] }
  0x88   : > { %v329_v56 = vld [vmem:[%s1608_s9 + $0x1e0] sm:$0xff]  ;;  %v330_v58 = vld [vmem:[%s1608_s9 + $0x1e8] sm:$0xff]  ;;  %v1091_v60 = vcombine.low %v318_v49, %v322_v50  ;;  %v1064_v24 = vcombine.high %v288_v19, %v292_v20  ;;  %v299_v26 = vld [vmem:[%s1608_s9 + $0xf0] sm:$0xff]  ;;  %v1061_v29 = vcombine.low %v287_v17, %v291_v18  ;;  %v1063_v30 = vcombine.low %v288_v19, %v292_v20 }
  0x89   : > { %v1098_v61 = vcombine.high %v325_v55, %v329_v56  ;;  %v1100_v62 = vcombine.high %v326_v57, %v330_v58  ;;  %v1097_v4 = vcombine.low %v325_v55, %v329_v56  ;;  %v1099_v5 = vcombine.low %v326_v57, %v330_v58  ;;  %v296_v27 = vld [vmem:[%s1608_s9 + $0xd8] sm:$0xff]  ;;  %v303_v33 = vld [vmem:[%s1608_s9 + $0x110] sm:$0xff] }
  0x8a   : > { %708 = vmatpush1.bf16.msra.mxu0 %v1065_v35  ;;  %751 = vmatpush1.bf16.msra.mxu1 %v1067_v36  ;;  %v300_v28 = vld [vmem:[%s1608_s9 + $0xf8] sm:$0xff]  ;;  %v1070_v31 = vcombine.high %v295_v25, %v299_v26  ;;  %v307_v34 = vld [vmem:[%s1608_s9 + $0x130] sm:$0xff] }
  0x8b   : > { %709 = vmatprep.subr.bf16.mxu0 %v1074_v37  ;;  %752 = vmatprep.subr.bf16.mxu1 %v1076_v38  ;;  %v1072_v32 = vcombine.high %v296_v27, %v300_v28  ;;  %v304_v35 = vld [vmem:[%s1608_s9 + $0x118] sm:$0xff]  ;;  %v1069_v37 = vcombine.low %v295_v25, %v299_v26  ;;  %v1078_v38 = vcombine.high %v303_v33, %v307_v34  ;;  %v311_v40 = vld [vmem:[%s1608_s9 + $0x150] sm:$0xff] }
  0x8c   : > { %v308_v36 = vld [vmem:[%s1608_s9 + $0x138] sm:$0xff]  ;;  %v315_v41 = vld [vmem:[%s1608_s9 + $0x170] sm:$0xff] }
  0x8d   : > { %v1080_v39 = vcombine.high %v304_v35, %v308_v36  ;;  %v312_v42 = vld [vmem:[%s1608_s9 + $0x158] sm:$0xff]  ;;  %v319_v48 = vld [vmem:[%s1608_s9 + $0x190] sm:$0xff] }
  0x8e   : > { %710 = vmatpush1.bf16.msra.mxu0 %v1073_v43  ;;  %753 = vmatpush1.bf16.msra.mxu1 %v1075_v44  ;;  %v316_v43 = vld [vmem:[%s1608_s9 + $0x178] sm:$0xff]  ;;  %v1077_v44 = vcombine.low %v303_v33, %v307_v34  ;;  %v323_v49 = vld [vmem:[%s1608_s9 + $0x1b0] sm:$0xff] }
  0x8f   : > { %711 = vmatprep.subr.bf16.mxu0 %v1082_v45  ;;  %754 = vmatprep.subr.bf16.mxu1 %v1084_v46  ;;  %v1079_v45 = vcombine.low %v304_v35, %v308_v36  ;;  %v1086_v46 = vcombine.high %v311_v40, %v315_v41  ;;  %v1088_v47 = vcombine.high %v312_v42, %v316_v43  ;;  %v320_v50 = vld [vmem:[%s1608_s9 + $0x198] sm:$0xff]  ;;  %v327_v56 = vld [vmem:[%s1608_s9 + $0x1d0] sm:$0xff] }
  0x90   : > { %v331_v57 = vld [vmem:[%s1608_s9 + $0x1f0] sm:$0xff]  ;;  %v328_v58 = vld [vmem:[%s1608_s9 + $0x1d8] sm:$0xff] }
  0x91   : > { %v1101_v1 = vcombine.low %v327_v56, %v331_v57 }
  0x92   : > { %712 = vmatpush1.bf16.msra.mxu0 %v1081_v51  ;;  %755 = vmatpush1.bf16.msra.mxu1 %v1083_v52  ;;  %v324_v51 = vld [vmem:[%s1608_s9 + $0x1b8] sm:$0xff]  ;;  %v1085_v52 = vcombine.low %v311_v40, %v315_v41 }
  0x93   : > { %713 = vmatprep.subr.bf16.mxu0 %v1090_v53  ;;  %756 = vmatprep.subr.bf16.mxu1 %v1092_v54  ;;  %v1087_v53 = vcombine.low %v312_v42, %v316_v43  ;;  %v1094_v54 = vcombine.high %v319_v48, %v323_v49  ;;  %v1096_v55 = vcombine.high %v320_v50, %v324_v51 }
  0x96   : > { %714 = vmatpush1.bf16.msra.mxu0 %v1089_v59  ;;  %757 = vmatpush1.bf16.msra.mxu1 %v1091_v60  ;;  %v332_v59 = vld [vmem:[%s1608_s9 + $0x1f8] sm:$0xff]  ;;  %v1093_v60 = vcombine.low %v319_v48, %v323_v49 }
  0x97   : > { %715 = vmatprep.subr.bf16.mxu0 %v1098_v61  ;;  %758 = vmatprep.subr.bf16.mxu1 %v1100_v62  ;;  %v1095_v61 = vcombine.low %v320_v50, %v324_v51  ;;  %v1102_v62 = vcombine.high %v327_v56, %v331_v57  ;;  %v1104_v63 = vcombine.high %v328_v58, %v332_v59 }
  0x98   : > { %v1103_v2 = vcombine.low %v328_v58, %v332_v59 }
  0x9a   : > { %716 = vmatpush1.bf16.msra.mxu0 %v1097_v4  ;;  %759 = vmatpush1.bf16.msra.mxu1 %v1099_v5  ;;  %v336_v4 = vshrl.u32 %v335_v3, 7 }
  0x9b   : > { %787 = vmatprep.subr.bf16.mxu0 %v1046_v6  ;;  %830 = vmatprep.subr.bf16.mxu1 %v1048_v7  ;;  %v333_v6 = vld [vmem:[%s233_s30] sm:$0xff] }
  0x9c   : > { %v337_v5 = vsub.s32 0, %v336_v4  ;;  %v345_v7 = vsub.s32 2, %v336_v4  ;;  %v341_v8 = vsub.s32 1, %v336_v4  ;;  %v349_v9 = vsub.s32 3, %v336_v4 }
  0x9d   : > { %734 = vmatmul.mubr.bf16.vlgmr.msra.gmra.mrb[0].mxu0 %v1654_v10  ;;  %777 = vmatmul.mubr.bf16.vlgmr.msra.gmra.mrb[0].mxu1 %v1654_v10  ;;  %v365_v33 = vsub.s32 7, %v336_v4 }
  0x9e   : > { %788 = vmatpush1.bf16.msra.mxu0 %v1045_v13  ;;  %831 = vmatpush1.bf16.msra.mxu1 %v1047_v14  ;;  %v338_v11 = vrot.slane %v333_v6, %v337_v5  ;;  %v346_v12 = vrot.slane %v333_v6, %v345_v7  ;;  %v342_v13 = vrot.slane %v333_v6, %v341_v8 }
  0x9f   : > { %789 = vmatprep.subr.bf16.mxu0 %v1054_v15  ;;  %832 = vmatprep.subr.bf16.mxu1 %v1056_v16  ;;  %v350_v14 = vrot.slane %v333_v6, %v349_v9 }
  0xa0   : > { %819 = vmatprep.mubr.bf16.mxu0 %v1385_v0  ;;  %862 = vmatprep.mubr.bf16.mxu1 %v1385_v0  ;;  %v1071_v0 = vcombine.low %v296_v27, %v300_v28 }
  0xa2   : > { %790 = vmatpush1.bf16.msra.mxu0 %v1053_v21  ;;  %833 = vmatpush1.bf16.msra.mxu1 %v1055_v22 }
  0xa3   : > { %791 = vmatprep.subr.bf16.mxu0 %v1062_v23  ;;  %834 = vmatprep.subr.bf16.mxu1 %v1064_v24 }
  0xa6   : > { %792 = vmatpush1.bf16.msra.mxu0 %v1061_v29  ;;  %835 = vmatpush1.bf16.msra.mxu1 %v1063_v30  ;;  %v353_v30 = vsub.s32 4, %v336_v4 }
  0xa7   : > { %793 = vmatprep.subr.bf16.mxu0 %v1070_v31  ;;  %836 = vmatprep.subr.bf16.mxu1 %v1072_v32  ;;  %v361_v31 = vsub.s32 6, %v336_v4  ;;  %v357_v32 = vsub.s32 5, %v336_v4 }
  0xa8   : > { %v354_v34 = vrot.slane %v333_v6, %v353_v30 }
  0xa9   : > { %v362_v35 = vrot.slane %v333_v6, %v361_v31  ;;  %v358_v36 = vrot.slane %v333_v6, %v357_v32 }
  0xaa   : > { %794 = vmatpush1.bf16.msra.mxu0 %v1069_v37  ;;  %837 = vmatpush1.bf16.msra.mxu1 %v1071_v0  ;;  %v366_v37 = vrot.slane %v333_v6, %v365_v33 }
  0xab   : > { %795 = vmatprep.subr.bf16.mxu0 %v1078_v38  ;;  %838 = vmatprep.subr.bf16.mxu1 %v1080_v39 }
  0xae   : > { %796 = vmatpush1.bf16.msra.mxu0 %v1077_v44  ;;  %839 = vmatpush1.bf16.msra.mxu1 %v1079_v45 }
  0xaf   : > { %797 = vmatprep.subr.bf16.mxu0 %v1086_v46  ;;  %840 = vmatprep.subr.bf16.mxu1 %v1088_v47 }
  0xb2   : > { %798 = vmatpush1.bf16.msra.mxu0 %v1085_v52  ;;  %841 = vmatpush1.bf16.msra.mxu1 %v1087_v53 }
  0xb3   : > { %799 = vmatprep.subr.bf16.mxu0 %v1094_v54  ;;  %842 = vmatprep.subr.bf16.mxu1 %v1096_v55 }
  0xb6   : > { %800 = vmatpush1.bf16.msra.mxu0 %v1093_v60  ;;  %843 = vmatpush1.bf16.msra.mxu1 %v1095_v61 }
  0xb7   : > { %801 = vmatprep.subr.bf16.mxu0 %v1102_v62  ;;  %844 = vmatprep.subr.bf16.mxu1 %v1104_v63 }
  0xba   : > { %802 = vmatpush1.bf16.msra.mxu0 %v1101_v1  ;;  %845 = vmatpush1.bf16.msra.mxu1 %v1103_v2 }
  0xbd   : > { %820 = vmatmul.mubr.bf16.vlgmr.msra.gmra.mrb[4].mxu0 %v1654_v10  ;;  %863 = vmatmul.mubr.bf16.vlgmr.msra.gmra.mrb[4].mxu1 %v1654_v10 }
 0x170   : > { %v735_v15 = vpop.f32.mrb[0].mxu0  ;;  %v778_v17 = vpop.f32.mrb[0].mxu1 }
 0x171   : > { %v736_v16 = vadd.f32 %v735_v15, %v338_v11  ;;  %v737_v18 = vpop.f32.mrb[1].mxu0  ;;  %v779_v19 = vadd.f32 %v778_v17, %v346_v12  ;;  %v780_v20 = vpop.f32.mrb[1].mxu1 }
 0x172   : > { %v738_v10 = vadd.f32 %v737_v18, %v342_v13  ;;  %v739_v21 = vpop.f32.mrb[2].mxu0  ;;  %v781_v22 = vadd.f32 %v780_v20, %v350_v14  ;;  %v782_v24 = vpop.f32.mrb[2].mxu1 }
 0x173   : > { %873 = vst [vmem:[%s1690_s8] sm:$0xff] %v736_v16  ;;  %v740_v23 = vadd.f32 %v739_v21, %v338_v11  ;;  %v741_v25 = vpop.f32.mrb[3].mxu0  ;;  %875 = vst [vmem:[%s1690_s8 + $0x10] sm:$0xff] %v779_v19  ;;  %v783_v26 = vadd.f32 %v782_v24, %v346_v12  ;;  %v784_v28 = vpop.f32.mrb[3].mxu1 }
 0x174   : > { %874 = vst [vmem:[%s1690_s8 + $0x8] sm:$0xff] %v738_v10  ;;  %v742_v27 = vadd.f32 %v741_v25, %v342_v13  ;;  %876 = vst [vmem:[%s1690_s8 + $0x18] sm:$0xff] %v781_v22  ;;  %v785_v29 = vadd.f32 %v784_v28, %v350_v14 }
 0x175   : > { %881 = vst [vmem:[%s1690_s8 + $0x40] sm:$0xff] %v740_v23  ;;  %883 = vst [vmem:[%s1690_s8 + $0x50] sm:$0xff] %v783_v26 }
 0x176   : > { %882 = vst [vmem:[%s1690_s8 + $0x48] sm:$0xff] %v742_v27  ;;  %884 = vst [vmem:[%s1690_s8 + $0x58] sm:$0xff] %v785_v29 }
 0x190   : > { %v821_v0 = vpop.f32.mrb[4].mxu0  ;;  %v864_v39 = vpop.f32.mrb[4].mxu1 }
 0x191   : > { %v822_v38 = vadd.f32 %v821_v0, %v354_v34  ;;  %v823_v40 = vpop.f32.mrb[5].mxu0  ;;  %v865_v41 = vadd.f32 %v864_v39, %v362_v35  ;;  %v866_v43 = vpop.f32.mrb[5].mxu1 }
 0x192   : > { %v824_v42 = vadd.f32 %v823_v40, %v358_v36  ;;  %v825_v44 = vpop.f32.mrb[6].mxu0  ;;  %v867_v45 = vadd.f32 %v866_v43, %v366_v37  ;;  %v868_v47 = vpop.f32.mrb[6].mxu1 }
 0x193   : > { %877 = vst [vmem:[%s1690_s8 + $0x20] sm:$0xff] %v822_v38  ;;  %v826_v46 = vadd.f32 %v825_v44, %v354_v34  ;;  %v827_v48 = vpop.f32.mrb[7].mxu0  ;;  %879 = vst [vmem:[%s1690_s8 + $0x30] sm:$0xff] %v865_v41  ;;  %v869_v49 = vadd.f32 %v868_v47, %v362_v35  ;;  %v870_v51 = vpop.f32.mrb[7].mxu1 }
 0x194   : > { %878 = vst [vmem:[%s1690_s8 + $0x28] sm:$0xff] %v824_v42  ;;  %v828_v50 = vadd.f32 %v827_v48, %v358_v36  ;;  %880 = vst [vmem:[%s1690_s8 + $0x38] sm:$0xff] %v867_v45  ;;  %v871_v52 = vadd.f32 %v870_v51, %v366_v37 }
 0x195   : > { %885 = vst [vmem:[%s1690_s8 + $0x60] sm:$0xff] %v826_v46  ;;  %887 = vst [vmem:[%s1690_s8 + $0x70] sm:$0xff] %v869_v49 }
 0x196   : > { %886 = vst [vmem:[%s1690_s8 + $0x68] sm:$0xff] %v828_v50  ;;  %888 = vst [vmem:[%s1690_s8 + $0x78] sm:$0xff] %v871_v52 }
 0x197   : > { %1302 = shalt.err (!%p1299_p8)
}
 0x198   : > { %s1303_s18 = scalar_lea.hbm %s1706_s21, 2048  ;;  %s1307_s6 = scalar_lea.hbm %s1767_s3, 4096 }
 0x199   : > { %p1304_p10 = scmp.ne.s32.totalorder %s1706_s21, %s1303_s18  ;;  %p1308_p3 = scmp.lt.u32.totalorder %s1706_s21, %s1767_s3 }
 0x19a   : > { %p1309_p2 = scmp.lt.u32.totalorder %s1307_s6, %s1303_s18  ;;  %p1311_p4 = scmp.lt.u32.totalorder %s1303_s18, %s1706_s21 }
 0x19b   : > { %p1305_p13 = pnand %p1304_p10, %p1792_p6 }
 0x19c   : > { %p1310_p11 = por %p1309_p2, %p1308_p3 }
 0x19d   : > { %p1306_p7 = pneg %p1305_p13 }
 0x19e   : > { %p1312_p1 = por %p1311_p4, %p1310_p11 }
 0x1a0   : > { %p1313_p12 = pnand %p1312_p1, %p1306_p7 }
 0x1a2   : > { %1316 = shalt.err (!%p1313_p12)
}
 0x1a3   : > { %s1387_s30 = smov 1024   ;;  %s1388_s7 = smov 2048  }
 0x1a4   : > { %s1389_s8 = smov 64  }
 0x1a5   : > { %1121 = dma.vmem_to_hbm [thread:$0]  (%p1792_p6), %s1710_s27, 2048, %s1706_s21, %s890_s23, %s1387_s30, %s1388_s7, %s1389_s8  }
 0x1a6 PF: > { %s921_s25 = sand.u32 1, %s1355_s12   ;;  %p1793_p0 = scmp.ne.s32.totalorder %s1782_s4, 0 }
 0x1a7   : > { %p1794_p9 = scmp.ge.s32.totalorder %s1375_s17, 2  ;;  %s922_s15 = scalar_lea.sflag [#allocation4], %s921_s25 }
 0x1a9   : > { %p1135_p5 = pnand %p1794_p9, %p1793_p0 }
 0x1ab   : > { %1350 = dma.done.wait (!%p1135_p5), %s922_s15, 2048  }
 0x1ac   : > { %1352 = vsyncadd (!%p1135_p5), %s922_s15, 4294965248  ;;  %s20_s17 = sadd.s32 1, %s1375_s17   ;;  %s1795_s28 = sld [smem:[#allocation12_spill]] }
 0x1ad   : > { %p17_p8 = scmp.ge.s32.totalorder %s20_s17, 4   ;;  %s1796_s12 = smov %s1359_s13 }
 0x1ae   : > { %s1797_s13 = smov %s1363_s14  ;;  %s1798_s14 = smov %s1458_s24 }
 0x1af   : > { %s1799_s15 = smov %s1371_s16  ;;  %19 = sbr.rel (!%p17_p8) target bundleno = 9 (0x9), region = 94 }
 0x1b2   : > { %s1800_s16 = smov %s1795_s28 }
 0x1b6   :  { %927 = vsyncpa [#allocation3], 1 }
 0x1b7   :  { %929 = vsyncpa [#allocation3 + $0x1], 1 }
 0x1b8   :  { %930 = vsyncpa [#allocation6], 1 }
 0x1b9   :  { %932 = vsyncpa [#allocation6 + $0x1], 1 }
 0x1ba   :  { %933 = vsyncpa [#allocation4], 1 }
 0x1bb   :  { %935 = vsyncpa [#allocation4 + $0x1], 1 }

</bundles_post_ra>
